<compile_context>
chip_gen: v5e
topology: v5e:2x2
jax: 0.10.0
libtpu: 0.0.40
codegen_flags: <defaults>
</compile_context>

<pallas_src>
import jax
import jax.numpy as jnp
from jax.experimental import pallas as pl
from jax.experimental.pallas import tpu as pltpu


def _make_dma_copy_kernel(bounds, lead_extent):
    """Kernel that copies x -> o via HBM->HBM DMA(s).

    bounds: static tuple of (start, size) chunks along the leading axis.
    """
    single_full = len(bounds) == 1 and bounds[0] == (0, lead_extent)

    def kernel(x_ref, o_ref, sem):
        if single_full:
            cp = pltpu.make_async_copy(x_ref, o_ref, sem.at[0])
            cp.start()
            cp.wait()
            return
        # Overlapped chunked DMAs: start all, then wait all.
        copies = []
        for i, (start, size) in enumerate(bounds):
            cp = pltpu.make_async_copy(
                x_ref.at[pl.ds(start, size)],
                o_ref.at[pl.ds(start, size)],
                sem.at[i],
            )
            cp.start()
            copies.append(cp)
        for cp in copies:
            cp.wait()

    return kernel


def _dma_copy(x: jax.Array, *, chunks=None) -> jax.Array:
    """Fresh-buffer copy of x via direct HBM->HBM DMA (no VMEM staging)."""
    n_bytes = x.size * x.dtype.itemsize
    lead = x.shape[0]

    if chunks is None:
        # A few overlapped descriptors for large arrays; one is plenty otherwise.
        chunks = 4 if n_bytes >= (4 << 20) else 1
    chunks = max(1, min(int(chunks), lead))

    # Balanced static chunk boundaries along the leading axis.
    base, rem = divmod(lead, chunks)
    bounds = []
    start = 0
    for i in range(chunks):
        size = base + (1 if i < rem else 0)
        bounds.append((start, size))
        start += size
    bounds = tuple(bounds)

    kernel = _make_dma_copy_kernel(bounds, lead)

    return pl.pallas_call(
        kernel,
        out_shape=jax.ShapeDtypeStruct(x.shape, x.dtype),
        in_specs=[pl.BlockSpec(memory_space=pl.ANY)],
        out_specs=pl.BlockSpec(memory_space=pl.ANY),
        scratch_shapes=[pltpu.SemaphoreType.DMA((chunks,))],
        cost_estimate=pl.CostEstimate(
            flops=0, transcendentals=0, bytes_accessed=2 * n_bytes
        ),
    )(x)


def identity(x: jax.Array, *, copy: bool = False, chunks=None) -> jax.Array:
    """Identity forward pass.

    Default (copy=False): returns x unchanged — true nn.Identity semantics,
    zero HBM traffic. With copy=True, returns a fresh buffer with identical
    contents via a direct HBM->HBM DMA copy kernel.
    """
    if not copy:
        return x
    if x.size == 0:
        return x
    if x.ndim == 0:
        # 0-d: copy through a trivially-reshaped (1,) view.
        return jnp.reshape(_dma_copy(jnp.reshape(x, (1,)), chunks=1), ())
    return _dma_copy(x, chunks=chunks)


if __name__ == "__main__":
    key = jax.random.PRNGKey(0)
    x = jax.random.normal(key, (2, 4, 16, 16), dtype=jnp.float32)  # NCHW

    # Default nn.Identity path: zero-cost passthrough.
    y0 = identity(x)
    assert y0 is x

    # Forced fresh-copy path: single HBM->HBM DMA.
    y1 = identity(x, copy=True)
    jax.block_until_ready(y1)
    assert y1.shape == x.shape, (y1.shape, x.shape)
    assert y1.dtype == x.dtype, (y1.dtype, x.dtype)
    assert bool(jnp.all(y1 == x)), "identity copy mismatch (single DMA)"

    # Chunked / overlapped-DMA path (exercised at a small size for coverage).
    x2 = jax.random.normal(jax.random.PRNGKey(0), (8, 32), dtype=jnp.float32)
    y2 = identity(x2, copy=True, chunks=2)
    jax.block_until_ready(y2)
    assert y2.shape == x2.shape and y2.dtype == x2.dtype
    assert bool(jnp.all(y2 == x2)), "identity copy mismatch (chunked DMA)"

    print("KERNEL_OK")
</pallas_src>

<mosaic_0001>
module attributes {stable_mosaic.version = 11 : i64} {
  func.func @kernel(%arg0: memref<2x4x16x16xf32, #tpu.memory_space<any>>, %arg1: memref<2x4x16x16xf32, #tpu.memory_space<any>>, %arg2: memref<1x!tpu.dma_semaphore, #tpu.memory_space<semaphore_mem>>) attributes {dimension_semantics = [], scalar_prefetch = 0 : i64, scratch_operands = 1 : i64, tpu.core_type = #tpu.core_type<tc>} {
    %c0_i32 = arith.constant 0 : i32
    %0 = tpu.memref_slice %arg2[%c0_i32] : memref<1x!tpu.dma_semaphore, #tpu.memory_space<semaphore_mem>> -> memref<1x!tpu.dma_semaphore, #tpu.memory_space<semaphore_mem>>
    %1 = tpu.memref_squeeze %0 : memref<1x!tpu.dma_semaphore, #tpu.memory_space<semaphore_mem>> -> memref<!tpu.dma_semaphore, #tpu.memory_space<semaphore_mem>>
    tpu.enqueue_dma source(%arg0 : memref<2x4x16x16xf32, #tpu.memory_space<any>>) target(%arg1 : memref<2x4x16x16xf32, #tpu.memory_space<any>>) target_semaphore(%1 : memref<!tpu.dma_semaphore, #tpu.memory_space<semaphore_mem>>)
    %c0_i32_0 = arith.constant 0 : i32
    %2 = tpu.memref_slice %arg2[%c0_i32_0] : memref<1x!tpu.dma_semaphore, #tpu.memory_space<semaphore_mem>> -> memref<1x!tpu.dma_semaphore, #tpu.memory_space<semaphore_mem>>
    %3 = tpu.memref_squeeze %2 : memref<1x!tpu.dma_semaphore, #tpu.memory_space<semaphore_mem>> -> memref<!tpu.dma_semaphore, #tpu.memory_space<semaphore_mem>>
    tpu.wait_dma2 semaphore(%3 : memref<!tpu.dma_semaphore, #tpu.memory_space<semaphore_mem>>) src(%arg0 : memref<2x4x16x16xf32, #tpu.memory_space<any>>) dst(%arg1 : memref<2x4x16x16xf32, #tpu.memory_space<any>>)
    return
  }
}

</mosaic_0001>

<bundles_post_ra>
// kernel: tpu_custom_call.1
= control target key start
LH: loop header
LB: loop body
LE: loop exit
PB: predicated region body
PF: predicated region fallthrough
CT: control target
= control target key end

     0   :  { %s34_s12 = smov [#allocation2]   ;;  %s35_s13 = smov [#allocation3]   ;;  %s53_s0 = inlined_call_operand.hbm [shape: f32[2,4,16,16], index: 0, kind: input, shape index: {}]   ;;  %s54_s1 = inlined_call_operand.hbm [shape: f32[2,4,16,16], index: 1, kind: output, shape index: {}]  }
   0x1   :  { %s10_s8 = sshll.u32 %s53_s0, 4  ;;  %s12_s11 = sshll.u32 %s54_s1, 4  ;;  %s11_s8 = int_to_ptr.hbm [resolvable:$true] %s10_s8  ;;  %s13_s11 = int_to_ptr.hbm [resolvable:$true] %s12_s11 }
   0x2   :  { %s36_s14 = smov 0  }
   0x3   :  { %16 = dma.general %s11_s8, 2048, %s13_s11, %s34_s12, %s35_s13, [#allocation4], %s36_s14, 0  }
   0x4   :  { %32 = dma.done.wait [#allocation2], 2048 }
   0x5   :  { %33 = vsyncadd [#allocation2], 4294965248 }
   0x6   :  { %22 = vsyncmov [#allocation2] }
   0x9   :  { %s23_s15 = vpop.sfrf %22 }
   0xa   :  { %p28_p0 = scmp.ne.s32.totalorder %s23_s15, 0 }
   0xc   :  { %27 = shalt.err (%p28_p0)  }

</bundles_post_ra>
